<compile_context>
chip_gen: v6e
topology: v6e:2x2x1
jax: 0.10.0
libtpu: 0.0.40
codegen_flags: <defaults>
</compile_context>

<pallas_src>
import functools
import math

import numpy as np
import jax
import jax.numpy as jnp
from jax import lax
from jax.experimental import pallas as pl
from jax.experimental.pallas import tpu as pltpu


def _round_up(x, m):
    return (x + m - 1) // m * m


def _pick_k_tile(kp):
    # kp is a multiple of 128; keep all of K resident when small, else tile it.
    if kp <= 1024:
        return kp
    for t in (1024, 512, 256, 128):
        if kp % t == 0:
            return t
    return 128


# ----------------------------- Pallas kernels ------------------------------ #

def _conv_stats_kernel(p_ref, w_ref, y_ref, psum_ref, psq_ref, acc_ref):
    # p_ref: (ts, tk) bf16 patches; w_ref: (tk, Cp) bf16 weights.
    # acc_ref: (ts, Cp) f32 VMEM accumulator over the K ("arbitrary") grid axis.
    k = pl.program_id(2)

    @pl.when(k == 0)
    def _():
        acc_ref[...] = jnp.zeros_like(acc_ref)

    acc_ref[...] += jnp.dot(p_ref[...], w_ref[...],
                            preferred_element_type=jnp.float32)

    @pl.when(k == pl.num_programs(2) - 1)
    def _():
        acc = acc_ref[...]                       # (ts, Cp) f32
        ts, cp = acc.shape
        cout = y_ref.shape[0]
        # Partial BN statistics as 8-sublane partial sums (all rows carry real data;
        # the tiny per-tile slabs are reduced in plain JAX).  Computed from the f32
        # accumulator *before* the bf16 cast of y, so BN accuracy is unaffected.
        psum_ref[...] = acc.reshape(ts // 8, 8, cp).sum(axis=0)
        psq_ref[...] = (acc * acc).reshape(ts // 8, 8, cp).sum(axis=0)
        # Channel-major bf16 conv intermediate: transpose on the (otherwise idle) XLU
        # and keep only the real channels -> exact-size, lane-dense (Cout, ts) store.
        y_ref[...] = acc.T[:cout, :].astype(y_ref.dtype)


def _bn_relu_kernel(y_ref, scale_ref, shift_ref, o_ref):
    # y_ref: (Cout, ts) bf16; scale/shift: resident (Cout, 1) f32 columns.
    y = y_ref[...].astype(jnp.float32)
    o_ref[...] = jnp.maximum(y * scale_ref[...] + shift_ref[...], 0.0)


# ------------------------------ plain-JAX glue ------------------------------ #

def _im2col_3d(x, ksize, stride, padding, dilation):
    # Per-sample im2col: (N, S, K) with S = Do*Ho*Wo, K = Cin*kd*kh*kw.
    N, Cin, D, H, W = x.shape
    kd, kh, kw = ksize
    sd, sh, sw = stride
    pd, ph, pw = padding
    dd, dh, dw = dilation
    Do = (D + 2 * pd - dd * (kd - 1) - 1) // sd + 1
    Ho = (H + 2 * ph - dh * (kh - 1) - 1) // sh + 1
    Wo = (W + 2 * pw - dw * (kw - 1) - 1) // sw + 1
    xp = jnp.pad(x, ((0, 0), (0, 0), (pd, pd), (ph, ph), (pw, pw)))
    slices = []
    for a in range(kd):
        for b in range(kh):
            for c in range(kw):
                sl = xp[:, :,
                        a * dd: a * dd + (Do - 1) * sd + 1: sd,
                        b * dh: b * dh + (Ho - 1) * sh + 1: sh,
                        c * dw: c * dw + (Wo - 1) * sw + 1: sw]
                slices.append(sl)
    # (N, Cin, kvol, Do, Ho, Wo) -> (N, Do, Ho, Wo, Cin, kvol) -> (N, S, Cin*kvol)
    patches = jnp.stack(slices, axis=2).transpose(0, 3, 4, 5, 1, 2)
    S = Do * Ho * Wo
    K = Cin * kd * kh * kw
    return patches.reshape(N, S, K), (Do, Ho, Wo)


def conv_bn_relu_forward(x, weight, bias, gamma, beta, *, stride, padding,
                         dilation=1, eps=1e-5):
    # TODO(synk): groups > 1 (grouped conv) not implemented; module default groups=1.
    # TODO(synk): BatchNorm running_mean/running_var momentum update (training-time
    #             buffer mutation) is not reproduced; only the forward output is.
    # TODO(synk): the bf16 im2col patch matrix is still materialized in HBM by XLA; a
    #             direct-from-x lowering with an in-kernel tap loop (halo'd x tile in
    #             VMEM) would cut the conv pass HBM traffic a further ~2-3x for 3^3
    #             kernels and is the main remaining lever.
    # NOTE: the conv bias is accepted but intentionally not added: training-mode BN
    #       subtracts the batch mean, so (y+b) - mean(y+b) == y - mean(y) and the
    #       forward output is identical without it (also keeps zero-padded rows exact
    #       zeros so they drop out of the BN sums).
    del bias
    N, Cin, D, H, W = x.shape
    Cout = weight.shape[0]
    ksize = tuple(weight.shape[2:])
    s3 = (stride,) * 3 if isinstance(stride, int) else tuple(stride)
    p3 = (padding,) * 3 if isinstance(padding, int) else tuple(padding)
    d3 = (dilation,) * 3 if isinstance(dilation, int) else tuple(dilation)

    # im2col in bf16 (f32 MXU accumulation), kept per-sample so padding never crosses
    # sample boundaries and the output can be written NCDHW-flat directly.
    P, (Do, Ho, Wo) = _im2col_3d(x.astype(jnp.bfloat16), ksize, s3, p3, d3)
    _, S, K = P.shape

    # Adaptive, lane-dense tiling.  Zero-padded rows / taps / channels contribute
    # exactly zero to the conv output and the BN sums (we divide by the real count).
    ts = min(1024, _round_up(S, 128))     # spatial rows per tile (both kernels)
    Sp = _round_up(S, ts)
    Kp = _round_up(K, 128)
    Cp = _round_up(Cout, 128)
    tk = _pick_k_tile(Kp)
    n_j = Sp // ts
    n_k = Kp // tk

    P = jnp.pad(P, ((0, 0), (0, Sp - S), (0, Kp - K)))
    Wmat = weight.reshape(Cout, K).T.astype(jnp.bfloat16)       # (K, Cout)
    Wmat = jnp.pad(Wmat, ((0, Kp - K), (0, Cp - Cout)))

    # --- kernel 1: K-tiled conv matmul fused with BN partials + channel-major y ---
    y_cm, psum, psq = pl.pallas_call(
        _conv_stats_kernel,
        out_shape=(jax.ShapeDtypeStruct((N, Cout, Sp), jnp.bfloat16),
                   jax.ShapeDtypeStruct((N * n_j * 8, Cp), jnp.float32),
                   jax.ShapeDtypeStruct((N * n_j * 8, Cp), jnp.float32)),
        grid=(N, n_j, n_k),
        in_specs=[pl.BlockSpec((None, ts, tk), lambda n, j, k: (n, j, k)),
                  pl.BlockSpec((tk, Cp), lambda n, j, k: (k, 0))],
        out_specs=(pl.BlockSpec((None, Cout, ts), lambda n, j, k: (n, 0, j)),
                   pl.BlockSpec((8, Cp), lambda n, j, k: (n * n_j + j, 0)),
                   pl.BlockSpec((8, Cp), lambda n, j, k: (n * n_j + j, 0))),
        scratch_shapes=[pltpu.VMEM((ts, Cp), jnp.float32)],
        compiler_params=pltpu.CompilerParams(
            dimension_semantics=("parallel", "parallel", "arbitrary"),
            vmem_limit_bytes=32 * 1024 * 1024),
    )(P, Wmat)

    # --- BN batch statistics + affine folded into per-channel scale/shift (tiny) ---
    # NOTE: E[x^2]-E[x]^2 in f32 can lose precision for huge M / large means; the
    # clamp guards against tiny negative variances (same semantics as before).
    total = jnp.float32(N * S)
    ssum = psum.sum(axis=0)[:Cout]
    ssq = psq.sum(axis=0)[:Cout]
    mean = ssum / total
    var = jnp.maximum(ssq / total - mean * mean, 0.0)   # biased, as PyTorch BN
    scale = gamma.astype(jnp.float32) * lax.rsqrt(var + eps)
    shift = beta.astype(jnp.float32) - mean * scale
    scale_col = scale.reshape(Cout, 1)
    shift_col = shift.reshape(Cout, 1)

    # --- kernel 2: y*scale + shift, ReLU, written straight into the NCDHW output ---
    out_cm = pl.pallas_call(
        _bn_relu_kernel,
        out_shape=jax.ShapeDtypeStruct((N, Cout, Sp), jnp.float32),
        grid=(N, n_j),
        in_specs=[pl.BlockSpec((None, Cout, ts), lambda n, j: (n, 0, j)),
                  pl.BlockSpec((Cout, 1), lambda n, j: (0, 0)),
                  pl.BlockSpec((Cout, 1), lambda n, j: (0, 0))],
        out_specs=pl.BlockSpec((None, Cout, ts), lambda n, j: (n, 0, j)),
        compiler_params=pltpu.CompilerParams(
            dimension_semantics=("parallel", "parallel"),
            vmem_limit_bytes=32 * 1024 * 1024),
    )(y_cm, scale_col, shift_col)

    if Sp != S:
        # Only non-tile-aligned spatial sizes pay this exact-size (no channel padding)
        # trailing slice; the common/aligned case has no XLA epilogue at all.
        out_cm = out_cm[:, :, :S]
    return out_cm.reshape(N, Cout, Do, Ho, Wo)


# ---------------------------------- main ----------------------------------- #

if __name__ == "__main__":
    key = jax.random.PRNGKey(0)
    k1, k2, k3, k4, k5 = jax.random.split(key, 5)

    N, Cin, Cout = 2, 4, 8
    D = H = W = 8
    ksz, stride, padding = 3, 1, 1

    x = jax.random.normal(k1, (N, Cin, D, H, W), jnp.float32)
    fan_in = Cin * ksz ** 3
    weight = jax.random.normal(k2, (Cout, Cin, ksz, ksz, ksz), jnp.float32) / math.sqrt(fan_in)
    bias = 0.1 * jax.random.normal(k3, (Cout,), jnp.float32)
    gamma = 1.0 + 0.1 * jax.random.normal(k4, (Cout,), jnp.float32)
    beta = 0.1 * jax.random.normal(k5, (Cout,), jnp.float32)

    fwd = jax.jit(functools.partial(conv_bn_relu_forward,
                                    stride=stride, padding=padding))
    out = jax.block_until_ready(fwd(x, weight, bias, gamma, beta))

    # Plain-JAX f32 reference (PyTorch training-mode BN semantics) for sanity.
    conv = lax.conv_general_dilated(
        x, weight, (stride,) * 3, [(padding, padding)] * 3,
        rhs_dilation=(1, 1, 1),
        dimension_numbers=("NCDHW", "OIDHW", "NCDHW"))
    conv = conv + bias.reshape(1, Cout, 1, 1, 1)
    m = conv.mean(axis=(0, 2, 3, 4), keepdims=True)
    v = conv.var(axis=(0, 2, 3, 4), keepdims=True)
    ref = jnp.maximum(
        (conv - m) / jnp.sqrt(v + 1e-5) * gamma.reshape(1, Cout, 1, 1, 1)
        + beta.reshape(1, Cout, 1, 1, 1), 0.0)

    assert out.shape == (N, Cout, D, H, W)
    # bf16 patches/weights + bf16 intermediate y (f32 accumulation / f32 stats)
    # -> slightly looser tolerance than pure f32.
    np.testing.assert_allclose(np.asarray(out), np.asarray(ref), atol=5e-2, rtol=3e-2)
    print("KERNEL_OK")
</pallas_src>

<mosaic_0001>
module attributes {stable_mosaic.version = 11 : i64} {
  func.func @_conv_stats_kernel(%arg0: i32, %arg1: i32, %arg2: i32, %arg3: memref<1x512x128xbf16, #tpu.memory_space<vmem>>, %arg4: memref<128x128xbf16, #tpu.memory_space<vmem>>, %arg5: memref<1x8x512xbf16, #tpu.memory_space<vmem>>, %arg6: memref<8x128xf32, #tpu.memory_space<vmem>>, %arg7: memref<8x128xf32, #tpu.memory_space<vmem>>, %arg8: memref<512x128xf32, #tpu.memory_space<vmem>>) attributes {dimension_semantics = [#tpu.dimension_semantics<parallel>, #tpu.dimension_semantics<parallel>, #tpu.dimension_semantics<arbitrary>], iteration_bounds = array<i64: 2, 1, 1>, scalar_prefetch = 0 : i64, scratch_operands = 1 : i64, tpu.core_type = #tpu.core_type<tc>, window_params = [{transform_indices = @transform_0, window_bounds = array<i64: 1, 512, 128>}, {transform_indices = @transform_1, window_bounds = array<i64: 128, 128>}, {transform_indices = @transform_2, window_bounds = array<i64: 1, 8, 512>}, {transform_indices = @transform_3, window_bounds = array<i64: 8, 128>}, {transform_indices = @transform_4, window_bounds = array<i64: 8, 128>}]} {
    %c0_i32 = arith.constant 0 : i32
    %0 = arith.cmpi eq, %arg2, %c0_i32 : i32
    %1 = arith.extui %0 : i1 to i32
    %c0_i32_0 = arith.constant 0 : i32
    %2 = arith.cmpi ne, %1, %c0_i32_0 : i32
    scf.if %2 {
      %cst_11 = arith.constant 0.000000e+00 : f32
      %13 = vector.broadcast %cst_11 : f32 to vector<512x128xf32>
      %c0_12 = arith.constant 0 : index
      %c0_13 = arith.constant 0 : index
      %14 = vector.load %arg8[%c0_12, %c0_13] : memref<512x128xf32, #tpu.memory_space<vmem>>, vector<512x128xf32>
      tpu.vector_store %arg8[%c0_12, %c0_13], %13 {strides = array<i32>} : memref<512x128xf32, #tpu.memory_space<vmem>>, vector<512x128xf32>,
    } else {
    }
    %c0 = arith.constant 0 : index
    %c0_1 = arith.constant 0 : index
    %3 = vector.load %arg8[%c0, %c0_1] : memref<512x128xf32, #tpu.memory_space<vmem>>, vector<512x128xf32>
    %c0_2 = arith.constant 0 : index
    %c0_3 = arith.constant 0 : index
    %c0_4 = arith.constant 0 : index
    %4 = vector.load %arg3[%c0_2, %c0_3, %c0_4] : memref<1x512x128xbf16, #tpu.memory_space<vmem>>, vector<1x512x128xbf16>
    %5 = vector.shape_cast %4 : vector<1x512x128xbf16> to vector<512x128xbf16>
    %c0_5 = arith.constant 0 : index
    %c0_6 = arith.constant 0 : index
    %6 = vector.load %arg4[%c0_5, %c0_6] : memref<128x128xbf16, #tpu.memory_space<vmem>>, vector<128x128xbf16>
    %cst = arith.constant dense<0.000000e+00> : vector<512x128xf32>
    %7 = tpu.matmul %5, %6, %cst {dimension_numbers = #tpu.dot_dimension_numbers<[1], [0], [0], [1], [0, 0, 1, 1], [], []>} : vector<512x128xbf16>, vector<128x128xbf16>, vector<512x128xf32> -> vector<512x128xf32>
    %8 = arith.addf %3, %7 : vector<512x128xf32>
    %c0_7 = arith.constant 0 : index
    %c0_8 = arith.constant 0 : index
    %9 = vector.load %arg8[%c0_7, %c0_8] : memref<512x128xf32, #tpu.memory_space<vmem>>, vector<512x128xf32>
    tpu.vector_store %arg8[%c0_7, %c0_8], %8 {strides = array<i32>} : memref<512x128xf32, #tpu.memory_space<vmem>>, vector<512x128xf32>,
    %c0_i32_9 = arith.constant 0 : i32
    %10 = arith.cmpi eq, %arg2, %c0_i32_9 : i32
    %11 = arith.extui %10 : i1 to i32
    %c0_i32_10 = arith.constant 0 : i32
    %12 = arith.cmpi ne, %11, %c0_i32_10 : i32
    scf.if %12 {
      %c0_11 = arith.constant 0 : index
      %c0_12 = arith.constant 0 : index
      %13 = vector.load %arg8[%c0_11, %c0_12] : memref<512x128xf32, #tpu.memory_space<vmem>>, vector<512x128xf32>
      %14 = vector.shape_cast %13 : vector<512x128xf32> to vector<64x8x128xf32>
      %cst_13 = arith.constant dense<0.000000e+00> : vector<8x128xf32>
      %15 = vector.multi_reduction <add>, %14, %cst_13 [0] : vector<64x8x128xf32> to vector<8x128xf32>
      %c0_14 = arith.constant 0 : index
      %c0_15 = arith.constant 0 : index
      %16 = vector.load %arg6[%c0_14, %c0_15] : memref<8x128xf32, #tpu.memory_space<vmem>>, vector<8x128xf32>
      tpu.vector_store %arg6[%c0_14, %c0_15], %15 {strides = array<i32>} : memref<8x128xf32, #tpu.memory_space<vmem>>, vector<8x128xf32>,
      %17 = arith.mulf %13, %13 : vector<512x128xf32>
      %18 = vector.shape_cast %17 : vector<512x128xf32> to vector<64x8x128xf32>
      %cst_16 = arith.constant dense<0.000000e+00> : vector<8x128xf32>
      %19 = vector.multi_reduction <add>, %18, %cst_16 [0] : vector<64x8x128xf32> to vector<8x128xf32>
      %c0_17 = arith.constant 0 : index
      %c0_18 = arith.constant 0 : index
      %20 = vector.load %arg7[%c0_17, %c0_18] : memref<8x128xf32, #tpu.memory_space<vmem>>, vector<8x128xf32>
      tpu.vector_store %arg7[%c0_17, %c0_18], %19 {strides = array<i32>} : memref<8x128xf32, #tpu.memory_space<vmem>>, vector<8x128xf32>,
      %21 = tpu.transpose %13, [1, 0] : vector<512x128xf32> -> vector<128x512xf32>
      %22 = vector.extract_strided_slice %21 {offsets = [0, 0], sizes = [8, 512], strides = [1, 1]} : vector<128x512xf32> to vector<8x512xf32>
      %23 = arith.truncf %22 : vector<8x512xf32> to vector<8x512xbf16>
      %c0_19 = arith.constant 0 : index
      %c0_20 = arith.constant 0 : index
      %c0_21 = arith.constant 0 : index
      %24 = vector.load %arg5[%c0_19, %c0_20, %c0_21] : memref<1x8x512xbf16, #tpu.memory_space<vmem>>, vector<1x8x512xbf16>
      %25 = vector.shape_cast %24 : vector<1x8x512xbf16> to vector<8x512xbf16>
      %26 = vector.shape_cast %23 : vector<8x512xbf16> to vector<1x8x512xbf16>
      tpu.vector_store %arg5[%c0_19, %c0_20, %c0_21], %26 {strides = array<i32>} : memref<1x8x512xbf16, #tpu.memory_space<vmem>>, vector<1x8x512xbf16>,
    } else {
    }
    return
  }
  func.func @transform_0(%arg0: i32, %arg1: i32, %arg2: i32) -> (i32, i32, i32) {
    %c0_i32 = arith.constant 0 : i32
    return %arg0, %arg1, %arg2 : i32, i32, i32
  }
  func.func @transform_1(%arg0: i32, %arg1: i32, %arg2: i32) -> (i32, i32) {
    %c0_i32 = arith.constant 0 : i32
    %c0_i32_0 = arith.constant 0 : i32
    return %arg2, %c0_i32 : i32, i32
  }
  func.func @transform_2(%arg0: i32, %arg1: i32, %arg2: i32) -> (i32, i32, i32) {
    %c0_i32 = arith.constant 0 : i32
    %c0_i32_0 = arith.constant 0 : i32
    return %arg0, %c0_i32, %arg1 : i32, i32, i32
  }
  func.func @transform_3(%arg0: i32, %arg1: i32, %arg2: i32) -> (i32, i32) {
    %c1_i32 = arith.constant 1 : i32
    %0 = arith.muli %arg0, %c1_i32 : i32
    %1 = arith.addi %0, %arg1 : i32
    %c0_i32 = arith.constant 0 : i32
    %c0_i32_0 = arith.constant 0 : i32
    return %1, %c0_i32 : i32, i32
  }
  func.func @transform_4(%arg0: i32, %arg1: i32, %arg2: i32) -> (i32, i32) {
    %c1_i32 = arith.constant 1 : i32
    %0 = arith.muli %arg0, %c1_i32 : i32
    %1 = arith.addi %0, %arg1 : i32
    %c0_i32 = arith.constant 0 : i32
    %c0_i32_0 = arith.constant 0 : i32
    return %1, %c0_i32 : i32, i32
  }
}

module attributes {stable_mosaic.version = 11 : i64} {
  func.func @_bn_relu_kernel(%arg0: i32, %arg1: i32, %arg2: memref<1x8x512xbf16, #tpu.memory_space<vmem>>, %arg3: memref<8x1xf32, #tpu.memory_space<vmem>>, %arg4: memref<8x1xf32, #tpu.memory_space<vmem>>, %arg5: memref<1x8x512xf32, #tpu.memory_space<vmem>>) attributes {dimension_semantics = [#tpu.dimension_semantics<parallel>, #tpu.dimension_semantics<parallel>], iteration_bounds = array<i64: 2, 1>, scalar_prefetch = 0 : i64, scratch_operands = 0 : i64, tpu.core_type = #tpu.core_type<tc>, window_params = [{transform_indices = @transform_0, window_bounds = array<i64: 1, 8, 512>}, {pipeline_mode = #tpu.pipeline_mode<synchronous>, transform_indices = @transform_1, window_bounds = array<i64: 8, 1>}, {pipeline_mode = #tpu.pipeline_mode<synchronous>, transform_indices = @transform_2, window_bounds = array<i64: 8, 1>}, {transform_indices = @transform_3, window_bounds = array<i64: 1, 8, 512>}]} {
    %c0 = arith.constant 0 : index
    %c0_0 = arith.constant 0 : index
    %c0_1 = arith.constant 0 : index
    %0 = vector.load %arg2[%c0, %c0_0, %c0_1] : memref<1x8x512xbf16, #tpu.memory_space<vmem>>, vector<1x8x512xbf16>
    %1 = vector.shape_cast %0 : vector<1x8x512xbf16> to vector<8x512xbf16>
    %2 = arith.extf %1 : vector<8x512xbf16> to vector<8x512xf32>
    %c0_2 = arith.constant 0 : index
    %c0_3 = arith.constant 0 : index
    %3 = vector.load %arg3[%c0_2, %c0_3] : memref<8x1xf32, #tpu.memory_space<vmem>>, vector<8x1xf32>
    %4 = vector.broadcast %3 : vector<8x1xf32> to vector<8x512xf32>
    %5 = arith.mulf %2, %4 : vector<8x512xf32>
    %c0_4 = arith.constant 0 : index
    %c0_5 = arith.constant 0 : index
    %6 = vector.load %arg4[%c0_4, %c0_5] : memref<8x1xf32, #tpu.memory_space<vmem>>, vector<8x1xf32>
    %7 = vector.broadcast %6 : vector<8x1xf32> to vector<8x512xf32>
    %8 = arith.addf %5, %7 : vector<8x512xf32>
    %cst = arith.constant 0.000000e+00 : f32
    %9 = vector.broadcast %cst : f32 to vector<8x512xf32>
    %10 = arith.maximumf %8, %9 : vector<8x512xf32>
    %c0_6 = arith.constant 0 : index
    %c0_7 = arith.constant 0 : index
    %c0_8 = arith.constant 0 : index
    %11 = vector.load %arg5[%c0_6, %c0_7, %c0_8] : memref<1x8x512xf32, #tpu.memory_space<vmem>>, vector<1x8x512xf32>
    %12 = vector.shape_cast %11 : vector<1x8x512xf32> to vector<8x512xf32>
    %13 = vector.shape_cast %10 : vector<8x512xf32> to vector<1x8x512xf32>
    tpu.vector_store %arg5[%c0_6, %c0_7, %c0_8], %13 {strides = array<i32>} : memref<1x8x512xf32, #tpu.memory_space<vmem>>, vector<1x8x512xf32>,
    return
  }
  func.func @transform_0(%arg0: i32, %arg1: i32) -> (i32, i32, i32) {
    %c0_i32 = arith.constant 0 : i32
    %c0_i32_0 = arith.constant 0 : i32
    return %arg0, %c0_i32, %arg1 : i32, i32, i32
  }
  func.func @transform_1(%arg0: i32, %arg1: i32) -> (i32, i32) {
    %c0_i32 = arith.constant 0 : i32
    %c0_i32_0 = arith.constant 0 : i32
    %c0_i32_1 = arith.constant 0 : i32
    return %c0_i32, %c0_i32_0 : i32, i32
  }
  func.func @transform_2(%arg0: i32, %arg1: i32) -> (i32, i32) {
    %c0_i32 = arith.constant 0 : i32
    %c0_i32_0 = arith.constant 0 : i32
    %c0_i32_1 = arith.constant 0 : i32
    return %c0_i32, %c0_i32_0 : i32, i32
  }
  func.func @transform_3(%arg0: i32, %arg1: i32) -> (i32, i32, i32) {
    %c0_i32 = arith.constant 0 : i32
    %c0_i32_0 = arith.constant 0 : i32
    return %arg0, %c0_i32, %arg1 : i32, i32, i32
  }
}

</mosaic_0001>

<bundles_post_ra>
// kernel: conv_bn_relu_forward.2
= control target key start
LH: loop header
LB: loop body
LE: loop exit
PB: predicated region body
PF: predicated region fallthrough
CT: control target
= control target key end

     0   :  { %s2142_s15 = smov 0   ;;  %s2144_s16 = smov 0   ;;  %s2580_s0 = inlined_call_operand.vmem [shape: bf16[2,512,128], index: 0, kind: input, shape index: {}]   ;;  %s2581_s1 = inlined_call_operand.vmem [shape: bf16[128,128], index: 1, kind: input, shape index: {}]   ;;  %s2582_s2 = inlined_call_operand.vmem [shape: bf16[2,8,512], index: 2, kind: output, shape index: {0}]   ;;  %s2583_s3 = inlined_call_operand.vmem [shape: f32[16,128], index: 3, kind: output, shape index: {1}]   ;;  %s2584_s4 = inlined_call_operand.vmem [shape: f32[16,128], index: 4, kind: output, shape index: {2}]  }
   0x1   :  { %s2146_s17 = smov 0  }
   0x2 LB: > { %s34_s18 = sadd.s32 1, %s2111_s16  ;;  %p1764_p0 = scmp.ge.s32.totalorder %s2115_s17, 1  ;;  %s2115_s17 = sphi %s2146_s17, %s15_s17   ;;  %s2111_s16 = sphi %s2144_s16, %s2586_s16   ;;  %s2107_s15 = sphi %s2142_s15, %s2585_s15  }
   0x3   : > { %p36_p1 = scmp.ge.s32.totalorder %s34_s18, 2  ;;  %p215_p2 = scmp.lt.s32.totalorder %s2115_s17, 3 }
   0x5   : > { %s2588_s18 = smov (%p36_p1, %s34_s18), 0  ;;  %p216_p3 = pnand %p1764_p0, %p215_p2 }
   0x6   : > { %p268_p4 = scmp.lt.s32.totalorder (!%p216_p3), %s2107_s15, 1 }
   0x7   : > { %219 = sbr.rel (%p216_p3) target bundleno = 405 (0x195), region = 28 }
   0xc   : > { %v2053_v0 = vld [vmem:[%s2581_s1 + $0x38] sm:$0xff]   ;;  %v2054_v1 = vld [vmem:[%s2581_s1 + $0x30] sm:$0xff]   ;;  %s2590_s15 = smov (!%p268_p4, %s2107_s15), 1  ;;  %v2055_v2 = vld [vmem:[%s2581_s1 + $0x28] sm:$0xff]  }
   0xd   : > { %1859 = vmatprep.subr.bf16.mxu0 %v2053_v0  ;;  %1939 = vmatprep.subr.bf16.mxu1 %v2053_v0  ;;  %s1815_s25 = sshll.u32 %s2590_s15, 8  ;;  %v2056_v3 = vld [vmem:[%s2581_s1 + $0x20] sm:$0xff]   ;;  %v2057_v6 = vld [vmem:[%s2581_s1 + $0x18] sm:$0xff]   ;;  %v2058_v7 = vld [vmem:[%s2581_s1 + $0x10] sm:$0xff]   ;;  %s1769_s13 = sshll.u32 %s2590_s15, 3 }
   0xe   : > { %1860 = vmatpush3.bf16.msra.mxu0 %v2053_v0  ;;  %1947 = vmatpush3.bf16.msra.mxu1 %v2053_v0  ;;  %s2175_s28 = scalar_lea.vmem %s2580_s0, %s1815_s25  ;;  %v2059_v8 = vld [vmem:[%s2581_s1 + $0x8] sm:$0xff]   ;;  %v2060_v9 = vld [vmem:[%s2581_s1] sm:$0xff]   ;;  %s300_s20 = scalar_lea.vmem %s2583_s3, %s1769_s13 }
   0xf   : > { %1861 = vmatprep.subr.bf16.mxu0 %v2054_v1  ;;  %1940 = vmatprep.subr.bf16.mxu1 %v2054_v1  ;;  %v2061_v4 = vld [vmem:[%s2175_s28] sm:$0xff]   ;;  %v2063_v10 = vld [vmem:[%s2175_s28 + $0x8] sm:$0xff]   ;;  %v2065_v12 = vld [vmem:[%s2175_s28 + $0x10] sm:$0xff]   ;;  %s306_s23 = scalar_lea.vmem %s2584_s4, %s1769_s13  ;;  %s1816_s24 = sshll.u32 %s2590_s15, 4 }
  0x10   : > { %v2062_v5 = vld [vmem:[%s2175_s28 + $0x80] sm:$0xff]   ;;  %1875 = vmatprep.mubr.bf16.mxu0 %v2061_v4  ;;  %v2064_v11 = vld [vmem:[%s2175_s28 + $0x88] sm:$0xff]   ;;  %v2066_v13 = vld [vmem:[%s2175_s28 + $0x90] sm:$0xff]   ;;  %s294_s27 = scalar_lea.vmem %s2582_s2, %s1816_s24 }
  0x11   : > { %1907 = vmatprep.mubr.bf16.mxu1 %v2062_v5  ;;  %v2067_v14 = vld [vmem:[%s2175_s28 + $0x18] sm:$0xff]   ;;  %v2069_v16 = vld [vmem:[%s2175_s28 + $0x20] sm:$0xff]   ;;  %v2071_v18 = vld [vmem:[%s2175_s28 + $0x28] sm:$0xff]  }
  0x12   : > { %1862 = vmatpush3.bf16.msra.mxu0 %v2054_v1  ;;  %1948 = vmatpush3.bf16.msra.mxu1 %v2054_v1  ;;  %v2068_v15 = vld [vmem:[%s2175_s28 + $0x98] sm:$0xff]   ;;  %v2070_v17 = vld [vmem:[%s2175_s28 + $0xa0] sm:$0xff]   ;;  %v2072_v19 = vld [vmem:[%s2175_s28 + $0xa8] sm:$0xff]  }
  0x13   : > { %1863 = vmatprep.subr.bf16.mxu0 %v2055_v2  ;;  %1941 = vmatprep.subr.bf16.mxu1 %v2055_v2  ;;  %v2073_v20 = vld [vmem:[%s2175_s28 + $0x30] sm:$0xff]   ;;  %v2075_v22 = vld [vmem:[%s2175_s28 + $0x38] sm:$0xff]   ;;  %v2077_v24 = vld [vmem:[%s2175_s28 + $0x40] sm:$0xff]  }
  0x14   : > { %v2074_v21 = vld [vmem:[%s2175_s28 + $0xb0] sm:$0xff]   ;;  %v2076_v23 = vld [vmem:[%s2175_s28 + $0xb8] sm:$0xff]   ;;  %v2078_v25 = vld [vmem:[%s2175_s28 + $0xc0] sm:$0xff]  }
  0x15   : > { %v2079_v26 = vld [vmem:[%s2175_s28 + $0x48] sm:$0xff]   ;;  %v2081_v28 = vld [vmem:[%s2175_s28 + $0x50] sm:$0xff]   ;;  %v2083_v30 = vld [vmem:[%s2175_s28 + $0x58] sm:$0xff]  }
  0x16   : > { %1864 = vmatpush3.bf16.msra.mxu0 %v2055_v2  ;;  %1949 = vmatpush3.bf16.msra.mxu1 %v2055_v2  ;;  %v2080_v27 = vld [vmem:[%s2175_s28 + $0xc8] sm:$0xff]   ;;  %v2082_v29 = vld [vmem:[%s2175_s28 + $0xd0] sm:$0xff]   ;;  %v2084_v31 = vld [vmem:[%s2175_s28 + $0xd8] sm:$0xff]  }
  0x17   : > { %1865 = vmatprep.subr.bf16.mxu0 %v2056_v3  ;;  %1942 = vmatprep.subr.bf16.mxu1 %v2056_v3  ;;  %v2085_v32 = vld [vmem:[%s2175_s28 + $0x60] sm:$0xff]   ;;  %v2087_v34 = vld [vmem:[%s2175_s28 + $0x68] sm:$0xff]   ;;  %v2089_v36 = vld [vmem:[%s2175_s28 + $0x70] sm:$0xff]  }
  0x18   : > { %v2086_v33 = vld [vmem:[%s2175_s28 + $0xe0] sm:$0xff]   ;;  %v2088_v35 = vld [vmem:[%s2175_s28 + $0xe8] sm:$0xff]   ;;  %v2090_v37 = vld [vmem:[%s2175_s28 + $0xf0] sm:$0xff]  }
  0x19   : > { %v2091_v38 = vld [vmem:[%s2175_s28 + $0x78] sm:$0xff]  }
  0x1a   : > { %1866 = vmatpush3.bf16.msra.mxu0 %v2056_v3  ;;  %1950 = vmatpush3.bf16.msra.mxu1 %v2056_v3  ;;  %v2092_v39 = vld [vmem:[%s2175_s28 + $0xf8] sm:$0xff]  }
  0x1b   : > { %1867 = vmatprep.subr.bf16.mxu0 %v2057_v6  ;;  %1943 = vmatprep.subr.bf16.mxu1 %v2057_v6 }
  0x1e   : > { %1868 = vmatpush3.bf16.msra.mxu0 %v2057_v6  ;;  %1951 = vmatpush3.bf16.msra.mxu1 %v2057_v6 }
  0x1f   : > { %1869 = vmatprep.subr.bf16.mxu0 %v2058_v7  ;;  %1944 = vmatprep.subr.bf16.mxu1 %v2058_v7 }
  0x22   : > { %1870 = vmatpush3.bf16.msra.mxu0 %v2058_v7  ;;  %1952 = vmatpush3.bf16.msra.mxu1 %v2058_v7 }
  0x23   : > { %1871 = vmatprep.subr.bf16.mxu0 %v2059_v8  ;;  %1945 = vmatprep.subr.bf16.mxu1 %v2059_v8 }
  0x26   : > { %1872 = vmatpush3.bf16.msra.mxu0 %v2059_v8  ;;  %1953 = vmatpush3.bf16.msra.mxu1 %v2059_v8 }
  0x27   : > { %1873 = vmatprep.subr.bf16.mxu0 %v2060_v9  ;;  %1946 = vmatprep.subr.bf16.mxu1 %v2060_v9 }
  0x2a   : > { %1874 = vmatpush3.bf16.msra.mxu0 %v2060_v9  ;;  %1954 = vmatpush3.bf16.msra.mxu1 %v2060_v9 }
  0x2d   : > { %1876 = vmatmul.mubr.bf16.vlgmr.msra.gmra.mxu0 %v2063_v10  ;;  %1908 = vmatmul.mubr.bf16.vlgmr.msra.gmra.mxu1 %v2064_v11 }
  0x2e   : > { %1879 = vmatprep.mubr.bf16.mxu0 %v2065_v12  ;;  %1911 = vmatprep.mubr.bf16.mxu1 %v2066_v13 }
  0x35   : > { %1880 = vmatmul.mubr.bf16.gmra.mxu0 %v2067_v14  ;;  %1912 = vmatmul.mubr.bf16.gmra.mxu1 %v2068_v15 }
  0x36   : > { %1883 = vmatprep.mubr.bf16.mxu0 %v2069_v16  ;;  %1915 = vmatprep.mubr.bf16.mxu1 %v2070_v17 }
  0x3d   : > { %1884 = vmatmul.mubr.bf16.gmra.mxu0 %v2071_v18  ;;  %1916 = vmatmul.mubr.bf16.gmra.mxu1 %v2072_v19 }
  0x3e   : > { %1887 = vmatprep.mubr.bf16.mxu0 %v2073_v20  ;;  %1919 = vmatprep.mubr.bf16.mxu1 %v2074_v21 }
  0x45   : > { %1888 = vmatmul.mubr.bf16.gmra.mxu0 %v2075_v22  ;;  %1920 = vmatmul.mubr.bf16.gmra.mxu1 %v2076_v23 }
  0x46   : > { %1891 = vmatprep.mubr.bf16.mxu0 %v2077_v24  ;;  %1923 = vmatprep.mubr.bf16.mxu1 %v2078_v25 }
  0x4d   : > { %1892 = vmatmul.mubr.bf16.gmra.mxu0 %v2079_v26  ;;  %1924 = vmatmul.mubr.bf16.gmra.mxu1 %v2080_v27 }
  0x4e   : > { %1895 = vmatprep.mubr.bf16.mxu0 %v2081_v28  ;;  %1927 = vmatprep.mubr.bf16.mxu1 %v2082_v29 }
  0x55   : > { %1896 = vmatmul.mubr.bf16.gmra.mxu0 %v2083_v30  ;;  %1928 = vmatmul.mubr.bf16.gmra.mxu1 %v2084_v31 }
  0x56   : > { %1899 = vmatprep.mubr.bf16.mxu0 %v2085_v32  ;;  %1931 = vmatprep.mubr.bf16.mxu1 %v2086_v33 }
  0x5d   : > { %1900 = vmatmul.mubr.bf16.gmra.mxu0 %v2087_v34  ;;  %1932 = vmatmul.mubr.bf16.gmra.mxu1 %v2088_v35 }
  0x5e   : > { %1903 = vmatprep.mubr.bf16.mxu0 %v2089_v36  ;;  %1935 = vmatprep.mubr.bf16.mxu1 %v2090_v37 }
  0x65   : > { %1904 = vmatmul.mubr.bf16.gmra.mxu0 %v2091_v38  ;;  %1936 = vmatmul.mubr.bf16.gmra.mxu1 %v2092_v39 }
  0xed   : > { %v2224_v40 = vpop.f32.mrf.mxu0  ;;  %v2226_v41 = vpop.f32.mrf.mxu1 }
  0xee   : > { %v1311_v53 = vmul.f32 %v2224_v40, %v2224_v40 }
  0xef   : > { %v2228_v42 = vpop.f32.mrf.mxu0  ;;  %v2230_v43 = vpop.f32.mrf.mxu1 }
  0xf0   : > { %v1309_v48 = vmul.f32 %v2228_v42, %v2228_v42 }
  0xf1   : > { %v2232_v44 = vpop.f32.mrf.mxu0  ;;  %v2234_v45 = vpop.f32.mrf.mxu1 }
  0xf2   : > { %v1312_v58 = vmul.f32 %v2232_v44, %v2232_v44 }
  0xf3   : > { %v2236_v46 = vpop.f32.mrf.mxu0  ;;  %v2238_v47 = vpop.f32.mrf.mxu1 }
  0xf4   : > { %v1245_v49 = vadd.f32 %v2236_v46, %v2228_v42  ;;  %v1310_v50 = vmul.f32 %v2236_v46, %v2236_v46 }
  0xf5   : > { %v2246_v51 = vpop.f32.mrf.mxu0  ;;  %v2248_v52 = vpop.f32.mrf.mxu1 }
  0xf6   : > { %v1246_v54 = vadd.f32 %v2224_v40, %v1245_v49  ;;  %v1373_v55 = vadd.f32 %v1310_v50, %v1309_v48  ;;  %v1315_v9 = vmul.f32 %v2246_v51, %v2246_v51 }
  0xf7   : > { %v2253_v56 = vpop.f32.mrf.mxu0  ;;  %v2255_v57 = vpop.f32.mrf.mxu1 }
  0xf8   : > { %v1374_v59 = vadd.f32 %v1373_v55, %v1311_v53  ;;  %v1247_v60 = vadd.f32 %v2232_v44, %v1246_v54  ;;  %v1313_v0 = vmul.f32 %v2253_v56, %v2253_v56 }
  0xf9   : > { %v2260_v61 = vpop.f32.mrf.mxu0  ;;  %v2262_v62 = vpop.f32.mrf.mxu1 }
  0xfa   : > { %v1248_v63 = vadd.f32 %v1247_v60, %v2253_v56  ;;  %v1375_v1 = vadd.f32 %v1374_v59, %v1312_v58  ;;  %v1316_v14 = vmul.f32 %v2260_v61, %v2260_v61 }
  0xfb   : > { %v2267_v2 = vpop.f32.mrf.mxu0  ;;  %v2269_v3 = vpop.f32.mrf.mxu1 }
  0xfc   : > { %v1376_v4 = vadd.f32 %v1375_v1, %v1313_v0  ;;  %v1249_v5 = vadd.f32 %v1248_v63, %v2267_v2  ;;  %v1314_v6 = vmul.f32 %v2267_v2, %v2267_v2 }
  0xfd   : > { %v2274_v7 = vpop.f32.mrf.mxu0  ;;  %v2276_v8 = vpop.f32.mrf.mxu1 }
  0xfe   : > { %v1250_v10 = vadd.f32 %v2246_v51, %v1249_v5  ;;  %v1377_v11 = vadd.f32 %v1376_v4, %v1314_v6  ;;  %v1319_v29 = vmul.f32 %v2274_v7, %v2274_v7 }
  0xff   : > { %v2281_v12 = vpop.f32.mrf.mxu0  ;;  %v2283_v13 = vpop.f32.mrf.mxu1 }
 0x100   : > { %v1378_v15 = vadd.f32 %v1377_v11, %v1315_v9  ;;  %v1251_v16 = vadd.f32 %v2260_v61, %v1250_v10  ;;  %v1317_v20 = vmul.f32 %v2281_v12, %v2281_v12 }
 0x101   : > { %v2288_v17 = vpop.f32.mrf.mxu0  ;;  %v2290_v18 = vpop.f32.mrf.mxu1 }
 0x102   : > { %v1252_v19 = vadd.f32 %v1251_v16, %v2281_v12  ;;  %v1379_v21 = vadd.f32 %v1378_v15, %v1316_v14  ;;  %v1320_v34 = vmul.f32 %v2288_v17, %v2288_v17 }
 0x103   : > { %v2295_v22 = vpop.f32.mrf.mxu0  ;;  %v2297_v23 = vpop.f32.mrf.mxu1 }
 0x104   : > { %v1380_v24 = vadd.f32 %v1379_v21, %v1317_v20  ;;  %v1253_v25 = vadd.f32 %v1252_v19, %v2295_v22  ;;  %v1318_v26 = vmul.f32 %v2295_v22, %v2295_v22 }
 0x105   : > { %v2302_v27 = vpop.f32.mrf.mxu0  ;;  %v2304_v28 = vpop.f32.mrf.mxu1 }
 0x106   : > { %v1254_v30 = vadd.f32 %v2274_v7, %v1253_v25  ;;  %v1381_v31 = vadd.f32 %v1380_v24, %v1318_v26  ;;  %v1323_v63 = vmul.f32 %v2302_v27, %v2302_v27 }
 0x107   : > { %v2309_v32 = vpop.f32.mrf.mxu0  ;;  %v2311_v33 = vpop.f32.mrf.mxu1 }
 0x108   : > { %v1382_v35 = vadd.f32 %v1381_v31, %v1319_v29  ;;  %v1255_v36 = vadd.f32 %v2288_v17, %v1254_v30  ;;  %v1321_v48 = vmul.f32 %v2309_v32, %v2309_v32 }
 0x109   : > { %v2316_v37 = vpop.f32.mrf.mxu0  ;;  %v2318_v38 = vpop.f32.mrf.mxu1 }
 0x10a   : > { %v1256_v39 = vadd.f32 %v1255_v36, %v2309_v32  ;;  %v1383_v49 = vadd.f32 %v1382_v35, %v1320_v34  ;;  %v1324_v6 = vmul.f32 %v2316_v37, %v2316_v37 }
 0x10b   : > { %v2323_v50 = vpop.f32.mrf.mxu0  ;;  %v2325_v53 = vpop.f32.mrf.mxu1 }
 0x10c   : > { %v1384_v54 = vadd.f32 %v1383_v49, %v1321_v48  ;;  %v1257_v55 = vadd.f32 %v1256_v39, %v2323_v50  ;;  %v1322_v58 = vmul.f32 %v2323_v50, %v2323_v50 }
 0x10d   : > { %v1893_v59 = vpop.f32.mrf.mxu0  ;;  %v2330_v60 = vpop.f32.mrf.mxu1 }
 0x10e   : > { %v1258_v0 = vadd.f32 %v2302_v27, %v1257_v55  ;;  %v1385_v1 = vadd.f32 %v1384_v54, %v1322_v58  ;;  %v1327_v36 = vmul.f32 %v1893_v59, %v1893_v59 }
 0x10f   : > { %v859_v4 = vpop.f32.mrf.mxu0  ;;  %v2335_v5 = vpop.f32.mrf.mxu1 }
 0x110   : > { %v1386_v9 = vadd.f32 %v1385_v1, %v1323_v63  ;;  %v1259_v10 = vadd.f32 %v2316_v37, %v1258_v0  ;;  %v2016_v15 = vpack.i.bf16 %v2335_v5, %v2230_v43  ;;  %v1979_v16 = vpack.i.bf16 %v859_v4, %v2228_v42 }
 0x111   : > { %v1894_v11 = vpop.f32.mrf.mxu0  ;;  %v2340_v14 = vpop.f32.mrf.mxu1  ;;  %v1325_v20 = vmul.f32 %v859_v4, %v859_v4  ;;  %v2020_v1 = vpack.i.bf16 %v2330_v60, %v2226_v41 }
 0x112   : > { %v1260_v19 = vadd.f32 %v1259_v10, %v859_v4  ;;  %v1387_v21 = vadd.f32 %v1386_v9, %v1324_v6  ;;  %2017 = vxpose.xlu1.b32.start [1/16] (narrow) %v2016_v15, 8  ;;  %1980 = vxpose.xlu0.b32.start [1/16] (narrow) %v1979_v16, 8  ;;  %v1328_v54 = vmul.f32 %v1894_v11, %v1894_v11 }
 0x113   : > { %v862_v24 = vpop.f32.mrf.mxu0  ;;  %v2345_v25 = vpop.f32.mrf.mxu1  ;;  %v1983_v4 = vpack.i.bf16 %v1893_v59, %v2224_v40  ;;  %v1985_v40 = vpack.i.bf16 %v1894_v11, %v2232_v44 }
 0x114   : > { %v1388_v26 = vadd.f32 %v1387_v21, %v1325_v20  ;;  %v1261_v29 = vadd.f32 %v1260_v19, %v862_v24  ;;  %v1326_v30 = vmul.f32 %v862_v24, %v862_v24  ;;  %v2018_v34 = vpack.i.bf16 %v2345_v25, %v2238_v47 }
 0x115   : > { %v2347_v31 = vpop.f32.mrf.mxu0  ;;  %v1981_v35 = vpack.i.bf16 %v862_v24, %v2236_v46  ;;  %v2352_v48 = vpop.f32.mrf.mxu1  ;;  %v2022_v24 = vpack.i.bf16 %v2340_v14, %v2234_v45 }
 0x116   : > { %v1262_v42 = vadd.f32 %v1893_v59, %v1261_v29  ;;  %v1389_v39 = vadd.f32 %v1388_v26, %v1326_v30  ;;  %2019 = vxpose.xlu1.b32.cont [2/16] (narrow) %v2018_v34, 8  ;;  %v1331_v15 = vmul.f32 %v2347_v31, %v2347_v31 }
 0x117   : > { %1982 = vxpose.xlu0.b32.cont [2/16] (narrow) %v1981_v35, 8  ;;  %v875_v49 = vpop.f32.mrf.mxu0  ;;  %v2359_v9 = vpop.f32.mrf.mxu1 }
 0x118   : > { %v1390_v55 = vadd.f32 %v1389_v39, %v1327_v36  ;;  %v1263_v58 = vadd.f32 %v1894_v11, %v1262_v42  ;;  %v1329_v63 = vmul.f32 %v875_v49, %v875_v49  ;;  %v2024_v44 = vpack.i.bf16 %v2359_v9, %v2255_v57 }
 0x119   : > { %v2354_v0 = vpop.f32.mrf.mxu0  ;;  %v2368_v59 = vpop.f32.mrf.mxu1  ;;  %v1987_v11 = vpack.i.bf16 %v875_v49, %v2253_v56 }
 0x11a   : > { %v1264_v46 = vadd.f32 %v1263_v58, %v875_v49  ;;  %v1391_v6 = vadd.f32 %v1390_v55, %v1328_v54  ;;  %2021 = vxpose.xlu1.b32.cont [3/16] (narrow) %v2020_v1, 8  ;;  %v1332_v34 = vmul.f32 %v2354_v0, %v2354_v0 }
 0x11b   : > { %1984 = vxpose.xlu0.b32.cont [3/16] (narrow) %v1983_v4, 8  ;;  %v878_v10 = vpop.f32.mrf.mxu0  ;;  %v2379_v54 = vpop.f32.mrf.mxu1 }
 0x11c   : > { %v1392_v16 = vadd.f32 %v1391_v6, %v1329_v63  ;;  %v1265_v19 = vadd.f32 %v1264_v46, %v878_v10  ;;  %v1330_v20 = vmul.f32 %v878_v10, %v878_v10  ;;  %v1989_v56 = vpack.i.bf16 %v878_v10, %v2267_v2 }
 0x11d   : > { %v2363_v21 = vpop.f32.mrf.mxu0  ;;  %v2388_v49 = vpop.f32.mrf.mxu1  ;;  %v2028_v2 = vpack.i.bf16 %v2352_v48, %v2248_v52  ;;  %v1991_v10 = vpack.i.bf16 %v2347_v31, %v2246_v51  ;;  %v2030_v51 = vpack.i.bf16 %v2368_v59, %v2262_v62 }
 0x11e   : > { %v1266_v26 = vadd.f32 %v2347_v31, %v1265_v19  ;;  %v1393_v29 = vadd.f32 %v1392_v16, %v1330_v20  ;;  %2023 = vxpose.xlu1.b32.cont [4/16] (narrow) %v2022_v24, 8  ;;  %v1335_v1 = vmul.f32 %v2363_v21, %v2363_v21  ;;  %v2026_v16 = vpack.i.bf16 %v2379_v54, %v2269_v3 }
 0x11f   : > { %1986 = vxpose.xlu0.b32.cont [4/16] (narrow) %v1985_v40, 8  ;;  %v891_v30 = vpop.f32.mrf.mxu0  ;;  %v1993_v31 = vpack.i.bf16 %v2354_v0, %v2260_v61  ;;  %v1341_v61 = vmul.f32 %v2230_v43, %v2230_v43 }
 0x120   : > { %v1394_v35 = vadd.f32 %v1393_v29, %v1331_v15  ;;  %v1267_v36 = vadd.f32 %v2354_v0, %v1266_v26  ;;  %v1333_v42 = vmul.f32 %v891_v30, %v891_v30 }
 0x121   : > { %v2374_v39 = vpop.f32.mrf.mxu0 }
 0x122   : > { %v1268_v55 = vadd.f32 %v1267_v36, %v891_v30  ;;  %v1395_v58 = vadd.f32 %v1394_v35, %v1332_v34  ;;  %2025 = vxpose.xlu1.b32.cont [5/16] (narrow) %v2024_v44, 8  ;;  %v1336_v19 = vmul.f32 %v2374_v39, %v2374_v39  ;;  %v2404_v36 = vpop.f32.mrf.mxu1 }
 0x123   : > { %1988 = vxpose.xlu0.b32.cont [5/16] (narrow) %v1987_v11, 8  ;;  %v894_v63 = vpop.f32.mrf.mxu0 }
 0x124   : > { %v1396_v4 = vadd.f32 %v1395_v58, %v1333_v42  ;;  %v1269_v46 = vadd.f32 %v1268_v55, %v894_v63  ;;  %v1334_v6 = vmul.f32 %v894_v63, %v894_v63 }
 0x125   : > { %v2383_v15 = vpop.f32.mrf.mxu0 }
 0x126   : > { %v1270_v20 = vadd.f32 %v2363_v21, %v1269_v46  ;;  %v1397_v24 = vadd.f32 %v1396_v4, %v1334_v6  ;;  %2027 = vxpose.xlu1.b32.cont [6/16] (narrow) %v2026_v16, 8  ;;  %v1339_v55 = vmul.f32 %v2383_v15, %v2383_v15  ;;  %v2418_v46 = vpop.f32.mrf.mxu1 }
 0x127   : > { %1990 = vxpose.xlu0.b32.cont [6/16] (narrow) %v1989_v56, 8  ;;  %v2393_v40 = vpop.f32.mrf.mxu0 }
 0x128   : > { %v1398_v26 = vadd.f32 %v1397_v24, %v1335_v1  ;;  %v1271_v29 = vadd.f32 %v2374_v39, %v1270_v20  ;;  %v1337_v34 = vmul.f32 %v2393_v40, %v2393_v40  ;;  %v2032_v24 = vpack.i.bf16 %v2404_v36, %v2283_v13  ;;  %v2429_v0 = vpop.f32.mrf.mxu1 }
 0x129   : > { %v2398_v35 = vpop.f32.mrf.mxu0 }
 0x12a   : > { %v1272_v42 = vadd.f32 %v1271_v29, %v2393_v40  ;;  %v1399_v44 = vadd.f32 %v1398_v26, %v1336_v19  ;;  %2029 = vxpose.xlu1.b32.cont [7/16] (narrow) %v2028_v2, 8  ;;  %v1340_v6 = vmul.f32 %v2398_v35, %v2398_v35  ;;  %v1995_v26 = vpack.i.bf16 %v891_v30, %v2281_v12 }
 0x12b   : > { %1992 = vxpose.xlu0.b32.cont [7/16] (narrow) %v1991_v10, 8  ;;  %v2407_v11 = vpop.f32.mrf.mxu0  ;;  %v1342_v2 = vmul.f32 %v2238_v47, %v2238_v47  ;;  %v1997_v12 = vpack.i.bf16 %v894_v63, %v2295_v22  ;;  %v1343_v30 = vmul.f32 %v2226_v41, %v2226_v41  ;;  %v1999_v22 = vpack.i.bf16 %v2363_v21, %v2274_v7 }
 0x12c   : > { %v1400_v58 = vadd.f32 %v1399_v44, %v1337_v34  ;;  %v1273_v1 = vadd.f32 %v1272_v42, %v2407_v11  ;;  %v1338_v4 = vmul.f32 %v2407_v11, %v2407_v11  ;;  %v2034_v44 = vpack.i.bf16 %v2429_v0, %v2297_v23 }
 0x12d   : > { %v1345_v63 = vmul.f32 %v2255_v57, %v2255_v57  ;;  %v2001_v7 = vpack.i.bf16 %v2374_v39, %v2288_v17  ;;  %v1347_v21 = vmul.f32 %v2248_v52, %v2248_v52  ;;  %v2003_v17 = vpack.i.bf16 %v2393_v40, %v2309_v32 }
 0x12e   : > { %v1274_v16 = vadd.f32 %v2383_v15, %v1273_v1  ;;  %v1401_v56 = vadd.f32 %v1400_v58, %v1338_v4  ;;  %2031 = vxpose.xlu1.b32.cont [8/16] (narrow) %v2030_v51, 8  ;;  %v1344_v1 = vmul.f32 %v2234_v45, %v2234_v45  ;;  %v2036_v51 = vpack.i.bf16 %v2388_v49, %v2276_v8 }
 0x12f   : > { %1994 = vxpose.xlu0.b32.cont [8/16] (narrow) %v1993_v31, 8  ;;  %v1349_v39 = vmul.f32 %v2283_v13, %v2283_v13  ;;  %v2005_v32 = vpack.i.bf16 %v2407_v11, %v2323_v50  ;;  %v2007_v50 = vpack.i.bf16 %v2383_v15, %v2302_v27  ;;  %v1353_v11 = vmul.f32 %v2311_v33, %v2311_v33 }
 0x130   : > { %v1275_v19 = vadd.f32 %v2398_v35, %v1274_v16  ;;  %v1402_v20 = vadd.f32 %v1401_v56, %v1339_v55  ;;  %v2440_v55 = vpop.f32.mrf.mxu1  ;;  %v2009_v27 = vpack.i.bf16 %v2398_v35, %v2316_v37  ;;  %v1355_v15 = vmul.f32 %v2304_v28, %v2304_v28 }
 0x131   : > { %v1358_v35 = vmul.f32 %v2345_v25, %v2345_v25 }
 0x132   : > { %v1276_v29 = vadd.f32 %v1275_v19, %v2230_v43  ;;  %v1403_v34 = vadd.f32 %v1402_v20, %v1340_v6  ;;  %2033 = vxpose.xlu1.b32.cont [9/16] (narrow) %v2032_v24, 8  ;;  %v2452_v31 = vpop.f32.mrf.mxu1  ;;  %v2038_v19 = vpack.i.bf16 %v2418_v46, %v2290_v18 }
 0x133   : > { %1996 = vxpose.xlu0.b32.cont [9/16] (narrow) %v1995_v26, 8 }
 0x134   : > { %v1277_v10 = vadd.f32 %v1276_v29, %v2238_v47  ;;  %v1404_v42 = vadd.f32 %v1403_v34, %v1341_v61  ;;  %v2464_v20 = vpop.f32.mrf.mxu1  ;;  %v2040_v29 = vpack.i.bf16 %v2452_v31, %v2311_v33 }
 0x136   : > { %v1278_v43 = vadd.f32 %v2226_v41, %v1277_v10  ;;  %v1405_v58 = vadd.f32 %v1404_v42, %v1342_v2  ;;  %2035 = vxpose.xlu1.b32.cont [10/16] (narrow) %v2034_v44, 8  ;;  %v2477_v2 = vpop.f32.mrf.mxu1 }
 0x137   : > { %1998 = vxpose.xlu0.b32.cont [10/16] (narrow) %v1997_v12, 8  ;;  %v2042_v44 = vpack.i.bf16 %v2477_v2, %v2325_v53 }
 0x138   : > { %v1279_v47 = vadd.f32 %v2234_v45, %v1278_v43  ;;  %v1406_v4 = vadd.f32 %v1405_v58, %v1343_v30  ;;  %v1346_v45 = vmul.f32 %v2269_v3, %v2269_v3  ;;  %v1352_v30 = vmul.f32 %v2290_v18, %v2290_v18 }
 0x139   : > { %v2044_v58 = vpack.i.bf16 %v2440_v55, %v2304_v28 }
 0x13a   : > { %v1280_v41 = vadd.f32 %v1279_v47, %v2255_v57  ;;  %v1407_v6 = vadd.f32 %v1406_v4, %v1344_v1  ;;  %2037 = vxpose.xlu1.b32.cont [11/16] (narrow) %v2036_v51, 8  ;;  %v1354_v47 = vmul.f32 %v2325_v53, %v2325_v53  ;;  %v2046_v51 = vpack.i.bf16 %v2464_v20, %v2318_v38 }
 0x13b   : > { %2000 = vxpose.xlu0.b32.cont [11/16] (narrow) %v1999_v22, 8 }
 0x13c   : > { %v1281_v16 = vadd.f32 %v1280_v41, %v2269_v3  ;;  %v1408_v56 = vadd.f32 %v1407_v6, %v1345_v63  ;;  %v1348_v3 = vmul.f32 %v2262_v62, %v2262_v62  ;;  %v1356_v63 = vmul.f32 %v2318_v38, %v2318_v38 }
 0x13d   : > { %v1357_v6 = vmul.f32 %v2335_v5, %v2335_v5 }
 0x13e   : > { %v1282_v57 = vadd.f32 %v2248_v52, %v1281_v16  ;;  %v1409_v24 = vadd.f32 %v1408_v56, %v1346_v45  ;;  %2039 = vxpose.xlu1.b32.cont [12/16] (narrow) %v2038_v19, 8  ;;  %v1359_v56 = vmul.f32 %v2330_v60, %v2330_v60 }
 0x13f   : > { %2002 = vxpose.xlu0.b32.cont [12/16] (narrow) %v2001_v7, 8 }
 0x140   : > { %v1283_v26 = vadd.f32 %v2262_v62, %v1282_v57  ;;  %v1410_v61 = vadd.f32 %v1409_v24, %v1347_v21  ;;  %v1350_v62 = vmul.f32 %v2297_v23, %v2297_v23 }
 0x142   : > { %v1284_v52 = vadd.f32 %v1283_v26, %v2283_v13  ;;  %v1411_v34 = vadd.f32 %v1410_v61, %v1348_v3  ;;  %2041 = vxpose.xlu1.b32.cont [13/16] (narrow) %v2040_v29, 8  ;;  %v1351_v13 = vmul.f32 %v2276_v8, %v2276_v8 }
 0x143   : > { %2004 = vxpose.xlu0.b32.cont [13/16] (narrow) %v2003_v17, 8 }
 0x144   : > { %v1285_v10 = vadd.f32 %v1284_v52, %v2297_v23  ;;  %v1412_v42 = vadd.f32 %v1411_v34, %v1349_v39 }
 0x146   : > { %v1286_v40 = vadd.f32 %v2276_v8, %v1285_v10  ;;  %v1413_v12 = vadd.f32 %v1412_v42, %v1350_v62  ;;  %2043 = vxpose.xlu1.b32.cont [14/16] (narrow) %v2042_v44, 8  ;;  %v1366_v62 = vmul.f32 %v2429_v0, %v2429_v0  ;;  %v1367_v42 = vmul.f32 %v2388_v49, %v2388_v49 }
 0x147   : > { %2006 = vxpose.xlu0.b32.cont [14/16] (narrow) %v2005_v32, 8  ;;  %v1368_v32 = vmul.f32 %v2418_v46, %v2418_v46 }
 0x148   : > { %v1287_v23 = vadd.f32 %v2290_v18, %v1286_v40  ;;  %v1414_v43 = vadd.f32 %v1413_v12, %v1351_v13 }
 0x14a   : > { %v1288_v8 = vadd.f32 %v1287_v23, %v2311_v33  ;;  %v1415_v1 = vadd.f32 %v1414_v43, %v1352_v30  ;;  %2045 = vxpose.xlu1.b32.cont [15/16] (narrow) %v2044_v58, 8  ;;  %v1371_v43 = vmul.f32 %v2440_v55, %v2440_v55 }
 0x14b   : > { %2008 = vxpose.xlu0.b32.cont [15/16] (narrow) %v2007_v50, 8 }
 0x14c   : > { %v1416_v4 = vadd.f32 %v1415_v1, %v1353_v11  ;;  %v1289_v18 = vadd.f32 %v1288_v8, %v2325_v53 }
 0x14e   : > { %v1290_v33 = vadd.f32 %v2304_v28, %v1289_v18  ;;  %v1417_v22 = vadd.f32 %v1416_v4, %v1354_v47  ;;  %2047 = vxpose.xlu1.b32.end [16/16] (narrow) %v2046_v51, 8 }
 0x14f   : > { %2010 = vxpose.xlu0.b32.end [16/16] (narrow) %v2009_v27, 8 }
 0x150   : > { %v1291_v41 = vadd.f32 %v2318_v38, %v1290_v33  ;;  %v1418_v53 = vadd.f32 %v1417_v22, %v1355_v15  ;;  %v1360_v38 = vmul.f32 %v2340_v14, %v2340_v14 }
 0x152   : > { %v1292_v45 = vadd.f32 %v1291_v41, %v2335_v5  ;;  %v1419_v37 = vadd.f32 %v1418_v53, %v1356_v63  ;;  %v1361_v5 = vmul.f32 %v2359_v9, %v2359_v9 }
 0x154   : > { %v1293_v28 = vadd.f32 %v1292_v45, %v2345_v25  ;;  %v1420_v16 = vadd.f32 %v1419_v37, %v1357_v6  ;;  %v1362_v25 = vmul.f32 %v2379_v54, %v2379_v54 }
 0x156   : > { %v1294_v19 = vadd.f32 %v2330_v60, %v1293_v28  ;;  %v1421_v7 = vadd.f32 %v1420_v16, %v1358_v35  ;;  %v1363_v60 = vmul.f32 %v2352_v48, %v2352_v48 }
 0x158   : > { %v1295_v21 = vadd.f32 %v2340_v14, %v1294_v19  ;;  %v1422_v57 = vadd.f32 %v1421_v7, %v1359_v56  ;;  %v1364_v14 = vmul.f32 %v2368_v59, %v2368_v59 }
 0x15a   : > { %v1296_v24 = vadd.f32 %v1295_v21, %v2359_v9  ;;  %v1423_v3 = vadd.f32 %v1422_v57, %v1360_v38  ;;  %v1365_v9 = vmul.f32 %v2404_v36, %v2404_v36 }
 0x15c   : > { %v1297_v26 = vadd.f32 %v1296_v24, %v2379_v54  ;;  %v1424_v61 = vadd.f32 %v1423_v3, %v1361_v5 }
 0x15e   : > { %v1298_v29 = vadd.f32 %v2352_v48, %v1297_v26  ;;  %v1425_v17 = vadd.f32 %v1424_v61, %v1362_v25 }
 0x160   : > { %v1299_v39 = vadd.f32 %v2368_v59, %v1298_v29  ;;  %v1426_v52 = vadd.f32 %v1425_v17, %v1363_v60 }
 0x162   : > { %v1300_v34 = vadd.f32 %v1299_v39, %v2404_v36  ;;  %v1427_v54 = vadd.f32 %v1426_v52, %v1364_v14  ;;  %v1369_v36 = vmul.f32 %v2452_v31, %v2452_v31 }
 0x164   : > { %v1301_v10 = vadd.f32 %v1300_v34, %v2429_v0  ;;  %v1428_v48 = vadd.f32 %v1427_v54, %v1365_v9 }
 0x166   : > { %v1302_v44 = vadd.f32 %v2388_v49, %v1301_v10  ;;  %v1429_v59 = vadd.f32 %v1428_v48, %v1366_v62  ;;  %v1370_v49 = vmul.f32 %v2477_v2, %v2477_v2 }
 0x168   : > { %v1303_v13 = vadd.f32 %v2418_v46, %v1302_v44  ;;  %v1430_v40 = vadd.f32 %v1429_v59, %v1367_v42 }
 0x16a   : > { %v1304_v12 = vadd.f32 %v1303_v13, %v2452_v31  ;;  %v1431_v30 = vadd.f32 %v1430_v40, %v1368_v32  ;;  %v1372_v31 = vmul.f32 %v2464_v20, %v2464_v20 }
 0x16c   : > { %v1305_v0 = vadd.f32 %v1304_v12, %v2477_v2  ;;  %v1432_v23 = vadd.f32 %v1431_v30, %v1369_v36 }
 0x16e   : > { %v1306_v46 = vadd.f32 %v2440_v55, %v1305_v0  ;;  %v1433_v58 = vadd.f32 %v1432_v23, %v1370_v49 }
 0x170   : > { %v1307_v50 = vadd.f32 %v2464_v20, %v1306_v46  ;;  %v1434_v11 = vadd.f32 %v1433_v58, %v1371_v43 }
 0x172   : > { %1308 = vst [vmem:[%s300_s20] sm:$0xff] %v1307_v50  ;;  %v1435_v2 = vadd.f32 %v1434_v11, %v1372_v31 }
 0x174   : > { %1436 = vst [vmem:[%s306_s23] sm:$0xff] %v1435_v2 }
 0x18e   : > { %v2048_v55 = vpop.trf.xlu1 }
 0x18f   : > { %v2011_v8 = vpop.trf.xlu0  ;;  %v2052_v1 = vunpack.i.h.bf16 %v2048_v55  ;;  %v2049_v47 = vunpack.i.l.bf16 %v2048_v55 }
 0x190   : > { %v2015_v4 = vunpack.i.h.bf16 %v2011_v8  ;;  %v2012_v18 = vunpack.i.l.bf16 %v2011_v8 }
 0x191   : > { %v1818_v20 = vpack.c.bf16 %v2052_v1, %v2049_v47 }
 0x192   : > { %v1817_v51 = vpack.c.bf16 %v2015_v4, %v2012_v18 }
 0x193   : > { %1582 = vst [vmem:[%s294_s27 + $0x8] sm:$0xff] %v1818_v20 }
 0x194   : > { %1581 = vst [vmem:[%s294_s27] sm:$0xff] %v1817_v51 }
 0x195 PF: > { %s15_s17 = sadd.s32 1, %s2115_s17   ;;  %s2585_s15 = smov %s2111_s16 }
 0x196   : > { %p12_p5 = scmp.ge.s32.totalorder %s15_s17, 4   ;;  %s2586_s16 = smov %s2588_s18 }
 0x198   :  { %14 = sbr.rel (!%p12_p5) target bundleno = 2 (0x2), region = 93 }

// kernel: conv_bn_relu_forward.3
= control target key start
LH: loop header
LB: loop body
LE: loop exit
PB: predicated region body
PF: predicated region fallthrough
CT: control target
= control target key end

     0   :  { %s415_s12 = smov 0   ;;  %s417_s13 = smov 0   ;;  %s454_s0 = inlined_call_operand.vmem [shape: bf16[2,8,512], index: 0, kind: input, shape index: {}]   ;;  %s455_s1 = inlined_call_operand.vmem [shape: f32[8,1], index: 1, kind: input, shape index: {}]   ;;  %s456_s2 = inlined_call_operand.vmem [shape: f32[8,1], index: 2, kind: input, shape index: {}]   ;;  %s457_s3 = inlined_call_operand.vmem [shape: f32[2,8,512], index: 3, kind: output, shape index: {}]  }
   0x1   :  { %s419_s14 = smov 0  }
   0x2 LB: > { %s25_s15 = sadd.s32 1, %s388_s13  ;;  %p335_p0 = scmp.ge.s32.totalorder %s392_s14, 1  ;;  %s392_s14 = sphi %s419_s14, %s13_s14   ;;  %s388_s13 = sphi %s417_s13, %s459_s13   ;;  %s384_s12 = sphi %s415_s12, %s458_s12  }
   0x3   : > { %p27_p1 = scmp.ge.s32.totalorder %s25_s15, 2  ;;  %p158_p2 = scmp.lt.s32.totalorder %s392_s14, 3 }
   0x5   : > { %s461_s15 = smov (%p27_p1, %s25_s15), 0  ;;  %p159_p3 = pnand %p335_p0, %p158_p2 }
   0x6   : > { %p191_p4 = scmp.lt.s32.totalorder (!%p159_p3), %s384_s12, 1 }
   0x7   : > { %162 = sbr.rel (%p159_p3) target bundleno = 148 (0x94), region = 32 }
   0xc   : > { %v216_v0 = vld [vmem:[%s455_s1] sm:$0xff]  ;;  %v394_v1 = vmov 0   ;;  %s463_s12 = smov (!%p191_p4, %s384_s12), 1 }
   0xd   : > { %369 = vset.pattern.permute.xlu0 %v394_v1  ;;  %v226_v2 = vld [vmem:[%s456_s2] sm:$0xff]  ;;  %s342_s20 = sshll.u32 %s463_s12, 4  ;;  %s343_s24 = sshll.u32 %s463_s12, 5 }
   0xe   : > { %219 = vperm.xlu0 %369, %v216_v0   ;;  %s198_s23 = scalar_lea.vmem %s454_s0, %s342_s20  ;;  %s208_s27 = scalar_lea.vmem %s457_s3, %s343_s24 }
   0xf   : > { %v210_v3 = vld [vmem:[%s198_s23] sm:$0xff]  ;;  %v211_v4 = vld [vmem:[%s198_s23 + $0x8] sm:$0xff] }
  0x10   : > { %v212_v5 = vunpack.c.l.bf16 %v210_v3  ;;  %v213_v6 = vunpack.c.h.bf16 %v210_v3  ;;  %v214_v7 = vunpack.c.l.bf16 %v211_v4  ;;  %v215_v8 = vunpack.c.h.bf16 %v211_v4 }
  0x12   : > { %229 = vperm.xlu0 %369, %v226_v2  }
  0x89   : > { %v220_v9 = vpop.permute.xlu0 %219 }
  0x8a   : > { %v222_v10 = vmul.f32 %v220_v9, %v212_v5  ;;  %v223_v11 = vmul.f32 %v220_v9, %v213_v6  ;;  %v224_v12 = vmul.f32 %v220_v9, %v214_v7  ;;  %v225_v13 = vmul.f32 %v220_v9, %v215_v8 }
  0x8d   : > { %v230_v14 = vpop.permute.xlu0 %229 }
  0x8e   : > { %v232_v15 = vadd.f32 %v230_v14, %v222_v10  ;;  %v233_v16 = vadd.f32 %v230_v14, %v223_v11  ;;  %v234_v17 = vadd.f32 %v230_v14, %v224_v12  ;;  %v235_v18 = vadd.f32 %v230_v14, %v225_v13 }
  0x90   : > { %v236_v19 = vmax.f32 %v232_v15, 0.0  ;;  %v237_v20 = vmax.f32 %v233_v16, 0.0  ;;  %v238_v21 = vmax.f32 %v234_v17, 0.0  ;;  %v239_v22 = vmax.f32 %v235_v18, 0.0 }
  0x92   : > { %240 = vst [vmem:[%s208_s27] sm:$0xff] %v236_v19  ;;  %241 = vst [vmem:[%s208_s27 + $0x8] sm:$0xff] %v237_v20 }
  0x93   : > { %242 = vst [vmem:[%s208_s27 + $0x10] sm:$0xff] %v238_v21  ;;  %243 = vst [vmem:[%s208_s27 + $0x18] sm:$0xff] %v239_v22 }
  0x94 PF: > { %s13_s14 = sadd.s32 1, %s392_s14   ;;  %s458_s12 = smov %s388_s13 }
  0x95   : > { %p10_p5 = scmp.ge.s32.totalorder %s13_s14, 4   ;;  %s459_s13 = smov %s461_s15 }
  0x97   :  { %12 = sbr.rel (!%p10_p5) target bundleno = 2 (0x2), region = 62 }

</bundles_post_ra>
